<compile_context>
chip_gen: v7x
topology: tpu7x:2x2x1
jax: 0.10.0
libtpu: 0.0.40
codegen_flags: <defaults>
</compile_context>

<pallas_src>
import jax
import jax.numpy as jnp
import numpy as np
from jax.experimental import pallas as pl
from jax.experimental.pallas import tpu as pltpu

EPS = 1e-5   # F.batch_norm default eps
K = 5        # conv kernel size
P = 2        # 'same' padding


def _pick_batch_block(n, c):
    """Samples folded per grid step.

    Priority: (1) folded rows (NB*C) % 8 == 0 -> sublane-full, aligned tiles and
    unmasked stores; (2) >= 2 parallel grid steps (v7x has 2 TensorCores);
    (3) as many parallel steps as possible.
    """
    best_nb, best_key = n, None
    for nb in range(1, n + 1):
        if n % nb:
            continue
        g = n // nb
        key = ((nb * c) % 8 == 0, g >= 2, g)
        if best_key is None or key > best_key:
            best_nb, best_key = nb, key
    return best_nb


def residual_forward(x, conv_w, conv_b, adain_w, adain_b):
    """x: (N, C, H, W) f32; conv_w: (C, C, 5, 5); conv_b: (C,);
    adain_w, adain_b: (N*C,) (AdaIN weight/bias assigned externally, as in MUNIT)."""
    N, C, H, W = x.shape
    HW = H * W
    NB = _pick_batch_block(N, C)
    G = N // NB
    R = NB * C                      # folded (sample, channel) rows per grid step

    # ---- cheap wrapper-side prep (pure reshapes + tiny constants, no big copies) ----
    x_fold = x.reshape(G, R, HW)    # x is read from HBM exactly once, in output layout

    # Per-tap conv weight, block-diagonal across the NB samples folded into a block:
    #   w_bd[t] = kron(I_NB, conv_w[:, :, kh, kw]),  t = kh*K + kw
    w_taps = jnp.transpose(conv_w, (2, 3, 0, 1)).reshape(K * K, C, C)
    eye_nb = jnp.eye(NB, dtype=conv_w.dtype)
    w_bd = jax.vmap(lambda wt: jnp.kron(eye_nb, wt))(w_taps)          # (25, R, R)

    # 0/1 validity mask per tap over the flattened HW axis ('same' zero padding).
    hh, ww = np.divmod(np.arange(HW), W)
    masks_np = np.zeros((K * K, HW), np.float32)
    for kh in range(K):
        for kw in range(K):
            dh, dw = kh - P, kw - P
            masks_np[kh * K + kw] = ((hh + dh >= 0) & (hh + dh < H) &
                                     (ww + dw >= 0) & (ww + dw < W))
    masks = jnp.asarray(masks_np)                                     # (25, HW)

    gamma = adain_w.reshape(G, R, 1).astype(jnp.float32)
    beta = adain_b.reshape(G, R, 1).astype(jnp.float32)
    # conv_b intentionally unused: a per-(n, c) constant added before instance norm
    # cancels exactly in (y - mean), so it has zero effect on the output.
    del conv_b

    def kernel(x_ref, w_ref, m_ref, g_ref, b_ref, o_ref):
        # x_ref : (R, HW)    folded (sample, channel) rows, spatial on lanes
        # w_ref : (25, R, R) per-tap block-diagonal conv weight (resident)
        # m_ref : (25, HW)   per-tap zero-padding masks (resident)
        # g_ref : (R, 1)     AdaIN gamma        b_ref: (R, 1) AdaIN beta
        # o_ref : (R, HW)    output rows (lane-dense store)
        x = x_ref[...]
        m_all = m_ref[...]

        # 5x5 'same' conv: per-tap lane-roll + mask + block-diag matmul, accumulated
        # in f32.  No im2col materialization, no concatenate copies.
        acc = jnp.zeros_like(x)
        for kh in range(K):
            for kw in range(K):
                t = kh * K + kw
                dh, dw = kh - P, kw - P
                s = dh * W + dw
                if s == 0:
                    shifted = x                                   # centre tap: no shift, mask all-ones
                else:
                    # want shifted[:, p] == x[:, (p + s) % HW] (jnp.roll convention)
                    shifted = pltpu.roll(x, (-s) % HW, axis=1)    # XLU lane rotate
                    shifted = shifted * m_all[t:t + 1, :]         # zero wrapped / out-of-image lanes
                acc = acc + jnp.dot(w_ref[t], shifted,
                                    preferred_element_type=jnp.float32)

        # Instance norm per (sample, channel) row over HW -- two-pass stats in f32,
        # gamma folded into the normalization scale (rsqrt stays on the EUP).
        inv_hw = jnp.float32(1.0 / HW)
        mu = jnp.sum(acc, axis=-1, keepdims=True) * inv_hw
        cen = acc - mu
        var = jnp.sum(cen * cen, axis=-1, keepdims=True) * inv_hw
        scale = g_ref[...] * jax.lax.rsqrt(var + EPS)
        z = cen * scale + b_ref[...]

        o_ref[...] = x + jnp.maximum(z, 0.0)                      # ReLU + residual skip

    out = pl.pallas_call(
        kernel,
        out_shape=jax.ShapeDtypeStruct((G, R, HW), jnp.float32),
        grid_spec=pltpu.PrefetchScalarGridSpec(
            num_scalar_prefetch=0,
            grid=(G,),
            in_specs=[
                pl.BlockSpec((None, R, HW), lambda g: (g, 0, 0)),   # x (read once, output layout)
                pl.BlockSpec((K * K, R, R), lambda g: (0, 0, 0)),   # per-tap conv weight (resident)
                pl.BlockSpec((K * K, HW), lambda g: (0, 0)),        # padding masks (resident)
                pl.BlockSpec((None, R, 1), lambda g: (g, 0, 0)),    # AdaIN gamma
                pl.BlockSpec((None, R, 1), lambda g: (g, 0, 0)),    # AdaIN beta
            ],
            out_specs=pl.BlockSpec((None, R, HW), lambda g: (g, 0, 0)),
        ),
        compiler_params=pltpu.CompilerParams(
            dimension_semantics=("parallel",)),
        cost_estimate=pl.CostEstimate(
            flops=int(2 * K * K * R * R * HW * G + 16 * N * C * HW),
            transcendentals=int(N * C),
            bytes_accessed=int(4 * (2 * N * C * HW + K * K * (R * R + HW) + 2 * N * C)),
        ),
    )(x_fold, w_bd, masks, gamma, beta)

    return out.reshape(N, C, H, W)


def residual_reference(x, conv_w, conv_b, adain_w, adain_b):
    """Pure-JAX reference matching the PyTorch forward (includes the conv bias)."""
    y = jax.lax.conv_general_dilated(
        x, conv_w, window_strides=(1, 1), padding=[(P, P), (P, P)],
        dimension_numbers=("NCHW", "OIHW", "NCHW"),
        precision=jax.lax.Precision.HIGHEST)
    y = y + conv_b[None, :, None, None]
    N, C, H, W = y.shape
    yr = y.reshape(N, C, H * W)
    mu = yr.mean(-1, keepdims=True)
    var = ((yr - mu) ** 2).mean(-1, keepdims=True)
    yh = (yr - mu) * jax.lax.rsqrt(var + EPS)
    z = adain_w.reshape(N, C, 1) * yh + adain_b.reshape(N, C, 1)
    return x + jnp.maximum(z, 0.0).reshape(N, C, H, W)


if __name__ == "__main__":
    N, C, H, W = 2, 4, 16, 16

    key = jax.random.PRNGKey(0)
    kx, kw, kb, kg, kbeta = jax.random.split(key, 5)

    x = jax.random.normal(kx, (N, C, H, W), dtype=jnp.float32)

    # PyTorch-like uniform init bounds for the conv.
    fan_in = C * K * K
    bound = 1.0 / (fan_in ** 0.5)
    conv_w = jax.random.uniform(kw, (C, C, K, K), jnp.float32, -bound, bound)
    conv_b = jax.random.uniform(kb, (C,), jnp.float32, -bound, bound)

    # AdaIN weight/bias must be assigned before the forward (length b*c); synthesize them.
    adain_w = 1.0 + 0.1 * jax.random.normal(kg, (N * C,), dtype=jnp.float32)
    adain_b = 0.1 * jax.random.normal(kbeta, (N * C,), dtype=jnp.float32)

    out = jax.block_until_ready(residual_forward(x, conv_w, conv_b, adain_w, adain_b))

    ref = residual_reference(x, conv_w, conv_b, adain_w, adain_b)
    err = float(jnp.max(jnp.abs(out - ref)))
    assert out.shape == (N, C, H, W)
    assert err < 2e-3, f"max abs err {err}"

    print("KERNEL_OK")
</pallas_src>

<mosaic_0001>
module attributes {stable_mosaic.version = 11 : i64} {
  func.func @kernel(%arg0: i32, %arg1: memref<1x8x256xf32, #tpu.memory_space<vmem>>, %arg2: memref<25x8x8xf32, #tpu.memory_space<vmem>>, %arg3: memref<25x256xf32, #tpu.memory_space<vmem>>, %arg4: memref<1x8x1xf32, #tpu.memory_space<vmem>>, %arg5: memref<1x8x1xf32, #tpu.memory_space<vmem>>, %arg6: memref<1x8x256xf32, #tpu.memory_space<vmem>>) attributes {dimension_semantics = [#tpu.dimension_semantics<parallel>], iteration_bounds = array<i64: 1>, scalar_prefetch = 0 : i64, scratch_operands = 0 : i64, tpu.core_type = #tpu.core_type<tc>, window_params = [{transform_indices = @transform_0, window_bounds = array<i64: 1, 8, 256>}, {pipeline_mode = #tpu.pipeline_mode<synchronous>, transform_indices = @transform_1, window_bounds = array<i64: 25, 8, 8>}, {pipeline_mode = #tpu.pipeline_mode<synchronous>, transform_indices = @transform_2, window_bounds = array<i64: 25, 256>}, {transform_indices = @transform_3, window_bounds = array<i64: 1, 8, 1>}, {transform_indices = @transform_4, window_bounds = array<i64: 1, 8, 1>}, {transform_indices = @transform_5, window_bounds = array<i64: 1, 8, 256>}]} {
    %c0 = arith.constant 0 : index
    %c0_0 = arith.constant 0 : index
    %c0_1 = arith.constant 0 : index
    %0 = vector.load %arg1[%c0, %c0_0, %c0_1] : memref<1x8x256xf32, #tpu.memory_space<vmem>>, vector<1x8x256xf32>
    %1 = vector.shape_cast %0 : vector<1x8x256xf32> to vector<8x256xf32>
    %c0_2 = arith.constant 0 : index
    %c0_3 = arith.constant 0 : index
    %2 = vector.load %arg3[%c0_2, %c0_3] : memref<25x256xf32, #tpu.memory_space<vmem>>, vector<25x256xf32>
    %cst = arith.constant 0.000000e+00 : f32
    %3 = vector.broadcast %cst : f32 to vector<8x256xf32>
    %c34_i32 = arith.constant 34 : i32
    %4 = tpu.dynamic_rotate %1 by %c34_i32 dim 1 : vector<8x256xf32>, i32 -> vector<8x256xf32>
    %5 = vector.extract_strided_slice %2 {offsets = [0, 0], sizes = [1, 256], strides = [1, 1]} : vector<25x256xf32> to vector<1x256xf32>
    %6 = vector.broadcast %5 : vector<1x256xf32> to vector<8x256xf32>
    %7 = arith.mulf %4, %6 : vector<8x256xf32>
    %c0_4 = arith.constant 0 : index
    %c0_5 = arith.constant 0 : index
    %c0_6 = arith.constant 0 : index
    %8 = vector.load %arg2[%c0_4, %c0_5, %c0_6] : memref<25x8x8xf32, #tpu.memory_space<vmem>>, vector<1x8x8xf32>
    %9 = vector.shape_cast %8 : vector<1x8x8xf32> to vector<8x8xf32>
    %cst_7 = arith.constant dense<0.000000e+00> : vector<8x256xf32>
    %10 = tpu.matmul %9, %7, %cst_7 {dimension_numbers = #tpu.dot_dimension_numbers<[1], [0], [0], [1], [0, 0, 1, 1], [], []>} : vector<8x8xf32>, vector<8x256xf32>, vector<8x256xf32> -> vector<8x256xf32>
    %11 = arith.addf %3, %10 : vector<8x256xf32>
    %c33_i32 = arith.constant 33 : i32
    %12 = tpu.dynamic_rotate %1 by %c33_i32 dim 1 : vector<8x256xf32>, i32 -> vector<8x256xf32>
    %13 = vector.extract_strided_slice %2 {offsets = [1, 0], sizes = [1, 256], strides = [1, 1]} : vector<25x256xf32> to vector<1x256xf32>
    %14 = vector.broadcast %13 : vector<1x256xf32> to vector<8x256xf32>
    %15 = arith.mulf %12, %14 : vector<8x256xf32>
    %c1 = arith.constant 1 : index
    %c0_8 = arith.constant 0 : index
    %c0_9 = arith.constant 0 : index
    %16 = vector.load %arg2[%c1, %c0_8, %c0_9] : memref<25x8x8xf32, #tpu.memory_space<vmem>>, vector<1x8x8xf32>
    %17 = vector.shape_cast %16 : vector<1x8x8xf32> to vector<8x8xf32>
    %cst_10 = arith.constant dense<0.000000e+00> : vector<8x256xf32>
    %18 = tpu.matmul %17, %15, %cst_10 {dimension_numbers = #tpu.dot_dimension_numbers<[1], [0], [0], [1], [0, 0, 1, 1], [], []>} : vector<8x8xf32>, vector<8x256xf32>, vector<8x256xf32> -> vector<8x256xf32>
    %19 = arith.addf %11, %18 : vector<8x256xf32>
    %c32_i32 = arith.constant 32 : i32
    %20 = tpu.dynamic_rotate %1 by %c32_i32 dim 1 : vector<8x256xf32>, i32 -> vector<8x256xf32>
    %21 = vector.extract_strided_slice %2 {offsets = [2, 0], sizes = [1, 256], strides = [1, 1]} : vector<25x256xf32> to vector<1x256xf32>
    %22 = vector.broadcast %21 : vector<1x256xf32> to vector<8x256xf32>
    %23 = arith.mulf %20, %22 : vector<8x256xf32>
    %c2 = arith.constant 2 : index
    %c0_11 = arith.constant 0 : index
    %c0_12 = arith.constant 0 : index
    %24 = vector.load %arg2[%c2, %c0_11, %c0_12] : memref<25x8x8xf32, #tpu.memory_space<vmem>>, vector<1x8x8xf32>
    %25 = vector.shape_cast %24 : vector<1x8x8xf32> to vector<8x8xf32>
    %cst_13 = arith.constant dense<0.000000e+00> : vector<8x256xf32>
    %26 = tpu.matmul %25, %23, %cst_13 {dimension_numbers = #tpu.dot_dimension_numbers<[1], [0], [0], [1], [0, 0, 1, 1], [], []>} : vector<8x8xf32>, vector<8x256xf32>, vector<8x256xf32> -> vector<8x256xf32>
    %27 = arith.addf %19, %26 : vector<8x256xf32>
    %c31_i32 = arith.constant 31 : i32
    %28 = tpu.dynamic_rotate %1 by %c31_i32 dim 1 : vector<8x256xf32>, i32 -> vector<8x256xf32>
    %29 = vector.extract_strided_slice %2 {offsets = [3, 0], sizes = [1, 256], strides = [1, 1]} : vector<25x256xf32> to vector<1x256xf32>
    %30 = vector.broadcast %29 : vector<1x256xf32> to vector<8x256xf32>
    %31 = arith.mulf %28, %30 : vector<8x256xf32>
    %c3 = arith.constant 3 : index
    %c0_14 = arith.constant 0 : index
    %c0_15 = arith.constant 0 : index
    %32 = vector.load %arg2[%c3, %c0_14, %c0_15] : memref<25x8x8xf32, #tpu.memory_space<vmem>>, vector<1x8x8xf32>
    %33 = vector.shape_cast %32 : vector<1x8x8xf32> to vector<8x8xf32>
    %cst_16 = arith.constant dense<0.000000e+00> : vector<8x256xf32>
    %34 = tpu.matmul %33, %31, %cst_16 {dimension_numbers = #tpu.dot_dimension_numbers<[1], [0], [0], [1], [0, 0, 1, 1], [], []>} : vector<8x8xf32>, vector<8x256xf32>, vector<8x256xf32> -> vector<8x256xf32>
    %35 = arith.addf %27, %34 : vector<8x256xf32>
    %c30_i32 = arith.constant 30 : i32
    %36 = tpu.dynamic_rotate %1 by %c30_i32 dim 1 : vector<8x256xf32>, i32 -> vector<8x256xf32>
    %37 = vector.extract_strided_slice %2 {offsets = [4, 0], sizes = [1, 256], strides = [1, 1]} : vector<25x256xf32> to vector<1x256xf32>
    %38 = vector.broadcast %37 : vector<1x256xf32> to vector<8x256xf32>
    %39 = arith.mulf %36, %38 : vector<8x256xf32>
    %c4 = arith.constant 4 : index
    %c0_17 = arith.constant 0 : index
    %c0_18 = arith.constant 0 : index
    %40 = vector.load %arg2[%c4, %c0_17, %c0_18] : memref<25x8x8xf32, #tpu.memory_space<vmem>>, vector<1x8x8xf32>
    %41 = vector.shape_cast %40 : vector<1x8x8xf32> to vector<8x8xf32>
    %cst_19 = arith.constant dense<0.000000e+00> : vector<8x256xf32>
    %42 = tpu.matmul %41, %39, %cst_19 {dimension_numbers = #tpu.dot_dimension_numbers<[1], [0], [0], [1], [0, 0, 1, 1], [], []>} : vector<8x8xf32>, vector<8x256xf32>, vector<8x256xf32> -> vector<8x256xf32>
    %43 = arith.addf %35, %42 : vector<8x256xf32>
    %c18_i32 = arith.constant 18 : i32
    %44 = tpu.dynamic_rotate %1 by %c18_i32 dim 1 : vector<8x256xf32>, i32 -> vector<8x256xf32>
    %45 = vector.extract_strided_slice %2 {offsets = [5, 0], sizes = [1, 256], strides = [1, 1]} : vector<25x256xf32> to vector<1x256xf32>
    %46 = vector.broadcast %45 : vector<1x256xf32> to vector<8x256xf32>
    %47 = arith.mulf %44, %46 : vector<8x256xf32>
    %c5 = arith.constant 5 : index
    %c0_20 = arith.constant 0 : index
    %c0_21 = arith.constant 0 : index
    %48 = vector.load %arg2[%c5, %c0_20, %c0_21] : memref<25x8x8xf32, #tpu.memory_space<vmem>>, vector<1x8x8xf32>
    %49 = vector.shape_cast %48 : vector<1x8x8xf32> to vector<8x8xf32>
    %cst_22 = arith.constant dense<0.000000e+00> : vector<8x256xf32>
    %50 = tpu.matmul %49, %47, %cst_22 {dimension_numbers = #tpu.dot_dimension_numbers<[1], [0], [0], [1], [0, 0, 1, 1], [], []>} : vector<8x8xf32>, vector<8x256xf32>, vector<8x256xf32> -> vector<8x256xf32>
    %51 = arith.addf %43, %50 : vector<8x256xf32>
    %c17_i32 = arith.constant 17 : i32
    %52 = tpu.dynamic_rotate %1 by %c17_i32 dim 1 : vector<8x256xf32>, i32 -> vector<8x256xf32>
    %53 = vector.extract_strided_slice %2 {offsets = [6, 0], sizes = [1, 256], strides = [1, 1]} : vector<25x256xf32> to vector<1x256xf32>
    %54 = vector.broadcast %53 : vector<1x256xf32> to vector<8x256xf32>
    %55 = arith.mulf %52, %54 : vector<8x256xf32>
    %c6 = arith.constant 6 : index
    %c0_23 = arith.constant 0 : index
    %c0_24 = arith.constant 0 : index
    %56 = vector.load %arg2[%c6, %c0_23, %c0_24] : memref<25x8x8xf32, #tpu.memory_space<vmem>>, vector<1x8x8xf32>
    %57 = vector.shape_cast %56 : vector<1x8x8xf32> to vector<8x8xf32>
    %cst_25 = arith.constant dense<0.000000e+00> : vector<8x256xf32>
    %58 = tpu.matmul %57, %55, %cst_25 {dimension_numbers = #tpu.dot_dimension_numbers<[1], [0], [0], [1], [0, 0, 1, 1], [], []>} : vector<8x8xf32>, vector<8x256xf32>, vector<8x256xf32> -> vector<8x256xf32>
    %59 = arith.addf %51, %58 : vector<8x256xf32>
    %c16_i32 = arith.constant 16 : i32
    %60 = tpu.dynamic_rotate %1 by %c16_i32 dim 1 : vector<8x256xf32>, i32 -> vector<8x256xf32>
    %61 = vector.extract_strided_slice %2 {offsets = [7, 0], sizes = [1, 256], strides = [1, 1]} : vector<25x256xf32> to vector<1x256xf32>
    %62 = vector.broadcast %61 : vector<1x256xf32> to vector<8x256xf32>
    %63 = arith.mulf %60, %62 : vector<8x256xf32>
    %c7 = arith.constant 7 : index
    %c0_26 = arith.constant 0 : index
    %c0_27 = arith.constant 0 : index
    %64 = vector.load %arg2[%c7, %c0_26, %c0_27] : memref<25x8x8xf32, #tpu.memory_space<vmem>>, vector<1x8x8xf32>
    %65 = vector.shape_cast %64 : vector<1x8x8xf32> to vector<8x8xf32>
    %cst_28 = arith.constant dense<0.000000e+00> : vector<8x256xf32>
    %66 = tpu.matmul %65, %63, %cst_28 {dimension_numbers = #tpu.dot_dimension_numbers<[1], [0], [0], [1], [0, 0, 1, 1], [], []>} : vector<8x8xf32>, vector<8x256xf32>, vector<8x256xf32> -> vector<8x256xf32>
    %67 = arith.addf %59, %66 : vector<8x256xf32>
    %c15_i32 = arith.constant 15 : i32
    %68 = tpu.dynamic_rotate %1 by %c15_i32 dim 1 : vector<8x256xf32>, i32 -> vector<8x256xf32>
    %69 = vector.extract_strided_slice %2 {offsets = [8, 0], sizes = [1, 256], strides = [1, 1]} : vector<25x256xf32> to vector<1x256xf32>
    %70 = vector.broadcast %69 : vector<1x256xf32> to vector<8x256xf32>
    %71 = arith.mulf %68, %70 : vector<8x256xf32>
    %c8 = arith.constant 8 : index
    %c0_29 = arith.constant 0 : index
    %c0_30 = arith.constant 0 : index
    %72 = vector.load %arg2[%c8, %c0_29, %c0_30] : memref<25x8x8xf32, #tpu.memory_space<vmem>>, vector<1x8x8xf32>
    %73 = vector.shape_cast %72 : vector<1x8x8xf32> to vector<8x8xf32>
    %cst_31 = arith.constant dense<0.000000e+00> : vector<8x256xf32>
    %74 = tpu.matmul %73, %71, %cst_31 {dimension_numbers = #tpu.dot_dimension_numbers<[1], [0], [0], [1], [0, 0, 1, 1], [], []>} : vector<8x8xf32>, vector<8x256xf32>, vector<8x256xf32> -> vector<8x256xf32>
    %75 = arith.addf %67, %74 : vector<8x256xf32>
    %c14_i32 = arith.constant 14 : i32
    %76 = tpu.dynamic_rotate %1 by %c14_i32 dim 1 : vector<8x256xf32>, i32 -> vector<8x256xf32>
    %77 = vector.extract_strided_slice %2 {offsets = [9, 0], sizes = [1, 256], strides = [1, 1]} : vector<25x256xf32> to vector<1x256xf32>
    %78 = vector.broadcast %77 : vector<1x256xf32> to vector<8x256xf32>
    %79 = arith.mulf %76, %78 : vector<8x256xf32>
    %c9 = arith.constant 9 : index
    %c0_32 = arith.constant 0 : index
    %c0_33 = arith.constant 0 : index
    %80 = vector.load %arg2[%c9, %c0_32, %c0_33] : memref<25x8x8xf32, #tpu.memory_space<vmem>>, vector<1x8x8xf32>
    %81 = vector.shape_cast %80 : vector<1x8x8xf32> to vector<8x8xf32>
    %cst_34 = arith.constant dense<0.000000e+00> : vector<8x256xf32>
    %82 = tpu.matmul %81, %79, %cst_34 {dimension_numbers = #tpu.dot_dimension_numbers<[1], [0], [0], [1], [0, 0, 1, 1], [], []>} : vector<8x8xf32>, vector<8x256xf32>, vector<8x256xf32> -> vector<8x256xf32>
    %83 = arith.addf %75, %82 : vector<8x256xf32>
    %c2_i32 = arith.constant 2 : i32
    %84 = tpu.dynamic_rotate %1 by %c2_i32 dim 1 : vector<8x256xf32>, i32 -> vector<8x256xf32>
    %85 = vector.extract_strided_slice %2 {offsets = [10, 0], sizes = [1, 256], strides = [1, 1]} : vector<25x256xf32> to vector<1x256xf32>
    %86 = vector.broadcast %85 : vector<1x256xf32> to vector<8x256xf32>
    %87 = arith.mulf %84, %86 : vector<8x256xf32>
    %c10 = arith.constant 10 : index
    %c0_35 = arith.constant 0 : index
    %c0_36 = arith.constant 0 : index
    %88 = vector.load %arg2[%c10, %c0_35, %c0_36] : memref<25x8x8xf32, #tpu.memory_space<vmem>>, vector<1x8x8xf32>
    %89 = vector.shape_cast %88 : vector<1x8x8xf32> to vector<8x8xf32>
    %cst_37 = arith.constant dense<0.000000e+00> : vector<8x256xf32>
    %90 = tpu.matmul %89, %87, %cst_37 {dimension_numbers = #tpu.dot_dimension_numbers<[1], [0], [0], [1], [0, 0, 1, 1], [], []>} : vector<8x8xf32>, vector<8x256xf32>, vector<8x256xf32> -> vector<8x256xf32>
    %91 = arith.addf %83, %90 : vector<8x256xf32>
    %c1_i32 = arith.constant 1 : i32
    %92 = tpu.dynamic_rotate %1 by %c1_i32 dim 1 : vector<8x256xf32>, i32 -> vector<8x256xf32>
    %93 = vector.extract_strided_slice %2 {offsets = [11, 0], sizes = [1, 256], strides = [1, 1]} : vector<25x256xf32> to vector<1x256xf32>
    %94 = vector.broadcast %93 : vector<1x256xf32> to vector<8x256xf32>
    %95 = arith.mulf %92, %94 : vector<8x256xf32>
    %c11 = arith.constant 11 : index
    %c0_38 = arith.constant 0 : index
    %c0_39 = arith.constant 0 : index
    %96 = vector.load %arg2[%c11, %c0_38, %c0_39] : memref<25x8x8xf32, #tpu.memory_space<vmem>>, vector<1x8x8xf32>
    %97 = vector.shape_cast %96 : vector<1x8x8xf32> to vector<8x8xf32>
    %cst_40 = arith.constant dense<0.000000e+00> : vector<8x256xf32>
    %98 = tpu.matmul %97, %95, %cst_40 {dimension_numbers = #tpu.dot_dimension_numbers<[1], [0], [0], [1], [0, 0, 1, 1], [], []>} : vector<8x8xf32>, vector<8x256xf32>, vector<8x256xf32> -> vector<8x256xf32>
    %99 = arith.addf %91, %98 : vector<8x256xf32>
    %c12 = arith.constant 12 : index
    %c0_41 = arith.constant 0 : index
    %c0_42 = arith.constant 0 : index
    %100 = vector.load %arg2[%c12, %c0_41, %c0_42] : memref<25x8x8xf32, #tpu.memory_space<vmem>>, vector<1x8x8xf32>
    %101 = vector.shape_cast %100 : vector<1x8x8xf32> to vector<8x8xf32>
    %cst_43 = arith.constant dense<0.000000e+00> : vector<8x256xf32>
    %102 = tpu.matmul %101, %1, %cst_43 {dimension_numbers = #tpu.dot_dimension_numbers<[1], [0], [0], [1], [0, 0, 1, 1], [], []>} : vector<8x8xf32>, vector<8x256xf32>, vector<8x256xf32> -> vector<8x256xf32>
    %103 = arith.addf %99, %102 : vector<8x256xf32>
    %c255_i32 = arith.constant 255 : i32
    %104 = tpu.dynamic_rotate %1 by %c255_i32 dim 1 : vector<8x256xf32>, i32 -> vector<8x256xf32>
    %105 = vector.extract_strided_slice %2 {offsets = [13, 0], sizes = [1, 256], strides = [1, 1]} : vector<25x256xf32> to vector<1x256xf32>
    %106 = vector.broadcast %105 : vector<1x256xf32> to vector<8x256xf32>
    %107 = arith.mulf %104, %106 : vector<8x256xf32>
    %c13 = arith.constant 13 : index
    %c0_44 = arith.constant 0 : index
    %c0_45 = arith.constant 0 : index
    %108 = vector.load %arg2[%c13, %c0_44, %c0_45] : memref<25x8x8xf32, #tpu.memory_space<vmem>>, vector<1x8x8xf32>
    %109 = vector.shape_cast %108 : vector<1x8x8xf32> to vector<8x8xf32>
    %cst_46 = arith.constant dense<0.000000e+00> : vector<8x256xf32>
    %110 = tpu.matmul %109, %107, %cst_46 {dimension_numbers = #tpu.dot_dimension_numbers<[1], [0], [0], [1], [0, 0, 1, 1], [], []>} : vector<8x8xf32>, vector<8x256xf32>, vector<8x256xf32> -> vector<8x256xf32>
    %111 = arith.addf %103, %110 : vector<8x256xf32>
    %c254_i32 = arith.constant 254 : i32
    %112 = tpu.dynamic_rotate %1 by %c254_i32 dim 1 : vector<8x256xf32>, i32 -> vector<8x256xf32>
    %113 = vector.extract_strided_slice %2 {offsets = [14, 0], sizes = [1, 256], strides = [1, 1]} : vector<25x256xf32> to vector<1x256xf32>
    %114 = vector.broadcast %113 : vector<1x256xf32> to vector<8x256xf32>
    %115 = arith.mulf %112, %114 : vector<8x256xf32>
    %c14 = arith.constant 14 : index
    %c0_47 = arith.constant 0 : index
    %c0_48 = arith.constant 0 : index
    %116 = vector.load %arg2[%c14, %c0_47, %c0_48] : memref<25x8x8xf32, #tpu.memory_space<vmem>>, vector<1x8x8xf32>
    %117 = vector.shape_cast %116 : vector<1x8x8xf32> to vector<8x8xf32>
    %cst_49 = arith.constant dense<0.000000e+00> : vector<8x256xf32>
    %118 = tpu.matmul %117, %115, %cst_49 {dimension_numbers = #tpu.dot_dimension_numbers<[1], [0], [0], [1], [0, 0, 1, 1], [], []>} : vector<8x8xf32>, vector<8x256xf32>, vector<8x256xf32> -> vector<8x256xf32>
    %119 = arith.addf %111, %118 : vector<8x256xf32>
    %c242_i32 = arith.constant 242 : i32
    %120 = tpu.dynamic_rotate %1 by %c242_i32 dim 1 : vector<8x256xf32>, i32 -> vector<8x256xf32>
    %121 = vector.extract_strided_slice %2 {offsets = [15, 0], sizes = [1, 256], strides = [1, 1]} : vector<25x256xf32> to vector<1x256xf32>
    %122 = vector.broadcast %121 : vector<1x256xf32> to vector<8x256xf32>
    %123 = arith.mulf %120, %122 : vector<8x256xf32>
    %c15 = arith.constant 15 : index
    %c0_50 = arith.constant 0 : index
    %c0_51 = arith.constant 0 : index
    %124 = vector.load %arg2[%c15, %c0_50, %c0_51] : memref<25x8x8xf32, #tpu.memory_space<vmem>>, vector<1x8x8xf32>
    %125 = vector.shape_cast %124 : vector<1x8x8xf32> to vector<8x8xf32>
    %cst_52 = arith.constant dense<0.000000e+00> : vector<8x256xf32>
    %126 = tpu.matmul %125, %123, %cst_52 {dimension_numbers = #tpu.dot_dimension_numbers<[1], [0], [0], [1], [0, 0, 1, 1], [], []>} : vector<8x8xf32>, vector<8x256xf32>, vector<8x256xf32> -> vector<8x256xf32>
    %127 = arith.addf %119, %126 : vector<8x256xf32>
    %c241_i32 = arith.constant 241 : i32
    %128 = tpu.dynamic_rotate %1 by %c241_i32 dim 1 : vector<8x256xf32>, i32 -> vector<8x256xf32>
    %129 = vector.extract_strided_slice %2 {offsets = [16, 0], sizes = [1, 256], strides = [1, 1]} : vector<25x256xf32> to vector<1x256xf32>
    %130 = vector.broadcast %129 : vector<1x256xf32> to vector<8x256xf32>
    %131 = arith.mulf %128, %130 : vector<8x256xf32>
    %c16 = arith.constant 16 : index
    %c0_53 = arith.constant 0 : index
    %c0_54 = arith.constant 0 : index
    %132 = vector.load %arg2[%c16, %c0_53, %c0_54] : memref<25x8x8xf32, #tpu.memory_space<vmem>>, vector<1x8x8xf32>
    %133 = vector.shape_cast %132 : vector<1x8x8xf32> to vector<8x8xf32>
    %cst_55 = arith.constant dense<0.000000e+00> : vector<8x256xf32>
    %134 = tpu.matmul %133, %131, %cst_55 {dimension_numbers = #tpu.dot_dimension_numbers<[1], [0], [0], [1], [0, 0, 1, 1], [], []>} : vector<8x8xf32>, vector<8x256xf32>, vector<8x256xf32> -> vector<8x256xf32>
    %135 = arith.addf %127, %134 : vector<8x256xf32>
    %c240_i32 = arith.constant 240 : i32
    %136 = tpu.dynamic_rotate %1 by %c240_i32 dim 1 : vector<8x256xf32>, i32 -> vector<8x256xf32>
    %137 = vector.extract_strided_slice %2 {offsets = [17, 0], sizes = [1, 256], strides = [1, 1]} : vector<25x256xf32> to vector<1x256xf32>
    %138 = vector.broadcast %137 : vector<1x256xf32> to vector<8x256xf32>
    %139 = arith.mulf %136, %138 : vector<8x256xf32>
    %c17 = arith.constant 17 : index
    %c0_56 = arith.constant 0 : index
    %c0_57 = arith.constant 0 : index
    %140 = vector.load %arg2[%c17, %c0_56, %c0_57] : memref<25x8x8xf32, #tpu.memory_space<vmem>>, vector<1x8x8xf32>
    %141 = vector.shape_cast %140 : vector<1x8x8xf32> to vector<8x8xf32>
    %cst_58 = arith.constant dense<0.000000e+00> : vector<8x256xf32>
    %142 = tpu.matmul %141, %139, %cst_58 {dimension_numbers = #tpu.dot_dimension_numbers<[1], [0], [0], [1], [0, 0, 1, 1], [], []>} : vector<8x8xf32>, vector<8x256xf32>, vector<8x256xf32> -> vector<8x256xf32>
    %143 = arith.addf %135, %142 : vector<8x256xf32>
    %c239_i32 = arith.constant 239 : i32
    %144 = tpu.dynamic_rotate %1 by %c239_i32 dim 1 : vector<8x256xf32>, i32 -> vector<8x256xf32>
    %145 = vector.extract_strided_slice %2 {offsets = [18, 0], sizes = [1, 256], strides = [1, 1]} : vector<25x256xf32> to vector<1x256xf32>
    %146 = vector.broadcast %145 : vector<1x256xf32> to vector<8x256xf32>
    %147 = arith.mulf %144, %146 : vector<8x256xf32>
    %c18 = arith.constant 18 : index
    %c0_59 = arith.constant 0 : index
    %c0_60 = arith.constant 0 : index
    %148 = vector.load %arg2[%c18, %c0_59, %c0_60] : memref<25x8x8xf32, #tpu.memory_space<vmem>>, vector<1x8x8xf32>
    %149 = vector.shape_cast %148 : vector<1x8x8xf32> to vector<8x8xf32>
    %cst_61 = arith.constant dense<0.000000e+00> : vector<8x256xf32>
    %150 = tpu.matmul %149, %147, %cst_61 {dimension_numbers = #tpu.dot_dimension_numbers<[1], [0], [0], [1], [0, 0, 1, 1], [], []>} : vector<8x8xf32>, vector<8x256xf32>, vector<8x256xf32> -> vector<8x256xf32>
    %151 = arith.addf %143, %150 : vector<8x256xf32>
    %c238_i32 = arith.constant 238 : i32
    %152 = tpu.dynamic_rotate %1 by %c238_i32 dim 1 : vector<8x256xf32>, i32 -> vector<8x256xf32>
    %153 = vector.extract_strided_slice %2 {offsets = [19, 0], sizes = [1, 256], strides = [1, 1]} : vector<25x256xf32> to vector<1x256xf32>
    %154 = vector.broadcast %153 : vector<1x256xf32> to vector<8x256xf32>
    %155 = arith.mulf %152, %154 : vector<8x256xf32>
    %c19 = arith.constant 19 : index
    %c0_62 = arith.constant 0 : index
    %c0_63 = arith.constant 0 : index
    %156 = vector.load %arg2[%c19, %c0_62, %c0_63] : memref<25x8x8xf32, #tpu.memory_space<vmem>>, vector<1x8x8xf32>
    %157 = vector.shape_cast %156 : vector<1x8x8xf32> to vector<8x8xf32>
    %cst_64 = arith.constant dense<0.000000e+00> : vector<8x256xf32>
    %158 = tpu.matmul %157, %155, %cst_64 {dimension_numbers = #tpu.dot_dimension_numbers<[1], [0], [0], [1], [0, 0, 1, 1], [], []>} : vector<8x8xf32>, vector<8x256xf32>, vector<8x256xf32> -> vector<8x256xf32>
    %159 = arith.addf %151, %158 : vector<8x256xf32>
    %c226_i32 = arith.constant 226 : i32
    %160 = tpu.dynamic_rotate %1 by %c226_i32 dim 1 : vector<8x256xf32>, i32 -> vector<8x256xf32>
    %161 = vector.extract_strided_slice %2 {offsets = [20, 0], sizes = [1, 256], strides = [1, 1]} : vector<25x256xf32> to vector<1x256xf32>
    %162 = vector.broadcast %161 : vector<1x256xf32> to vector<8x256xf32>
    %163 = arith.mulf %160, %162 : vector<8x256xf32>
    %c20 = arith.constant 20 : index
    %c0_65 = arith.constant 0 : index
    %c0_66 = arith.constant 0 : index
    %164 = vector.load %arg2[%c20, %c0_65, %c0_66] : memref<25x8x8xf32, #tpu.memory_space<vmem>>, vector<1x8x8xf32>
    %165 = vector.shape_cast %164 : vector<1x8x8xf32> to vector<8x8xf32>
    %cst_67 = arith.constant dense<0.000000e+00> : vector<8x256xf32>
    %166 = tpu.matmul %165, %163, %cst_67 {dimension_numbers = #tpu.dot_dimension_numbers<[1], [0], [0], [1], [0, 0, 1, 1], [], []>} : vector<8x8xf32>, vector<8x256xf32>, vector<8x256xf32> -> vector<8x256xf32>
    %167 = arith.addf %159, %166 : vector<8x256xf32>
    %c225_i32 = arith.constant 225 : i32
    %168 = tpu.dynamic_rotate %1 by %c225_i32 dim 1 : vector<8x256xf32>, i32 -> vector<8x256xf32>
    %169 = vector.extract_strided_slice %2 {offsets = [21, 0], sizes = [1, 256], strides = [1, 1]} : vector<25x256xf32> to vector<1x256xf32>
    %170 = vector.broadcast %169 : vector<1x256xf32> to vector<8x256xf32>
    %171 = arith.mulf %168, %170 : vector<8x256xf32>
    %c21 = arith.constant 21 : index
    %c0_68 = arith.constant 0 : index
    %c0_69 = arith.constant 0 : index
    %172 = vector.load %arg2[%c21, %c0_68, %c0_69] : memref<25x8x8xf32, #tpu.memory_space<vmem>>, vector<1x8x8xf32>
    %173 = vector.shape_cast %172 : vector<1x8x8xf32> to vector<8x8xf32>
    %cst_70 = arith.constant dense<0.000000e+00> : vector<8x256xf32>
    %174 = tpu.matmul %173, %171, %cst_70 {dimension_numbers = #tpu.dot_dimension_numbers<[1], [0], [0], [1], [0, 0, 1, 1], [], []>} : vector<8x8xf32>, vector<8x256xf32>, vector<8x256xf32> -> vector<8x256xf32>
    %175 = arith.addf %167, %174 : vector<8x256xf32>
    %c224_i32 = arith.constant 224 : i32
    %176 = tpu.dynamic_rotate %1 by %c224_i32 dim 1 : vector<8x256xf32>, i32 -> vector<8x256xf32>
    %177 = vector.extract_strided_slice %2 {offsets = [22, 0], sizes = [1, 256], strides = [1, 1]} : vector<25x256xf32> to vector<1x256xf32>
    %178 = vector.broadcast %177 : vector<1x256xf32> to vector<8x256xf32>
    %179 = arith.mulf %176, %178 : vector<8x256xf32>
    %c22 = arith.constant 22 : index
    %c0_71 = arith.constant 0 : index
    %c0_72 = arith.constant 0 : index
    %180 = vector.load %arg2[%c22, %c0_71, %c0_72] : memref<25x8x8xf32, #tpu.memory_space<vmem>>, vector<1x8x8xf32>
    %181 = vector.shape_cast %180 : vector<1x8x8xf32> to vector<8x8xf32>
    %cst_73 = arith.constant dense<0.000000e+00> : vector<8x256xf32>
    %182 = tpu.matmul %181, %179, %cst_73 {dimension_numbers = #tpu.dot_dimension_numbers<[1], [0], [0], [1], [0, 0, 1, 1], [], []>} : vector<8x8xf32>, vector<8x256xf32>, vector<8x256xf32> -> vector<8x256xf32>
    %183 = arith.addf %175, %182 : vector<8x256xf32>
    %c223_i32 = arith.constant 223 : i32
    %184 = tpu.dynamic_rotate %1 by %c223_i32 dim 1 : vector<8x256xf32>, i32 -> vector<8x256xf32>
    %185 = vector.extract_strided_slice %2 {offsets = [23, 0], sizes = [1, 256], strides = [1, 1]} : vector<25x256xf32> to vector<1x256xf32>
    %186 = vector.broadcast %185 : vector<1x256xf32> to vector<8x256xf32>
    %187 = arith.mulf %184, %186 : vector<8x256xf32>
    %c23 = arith.constant 23 : index
    %c0_74 = arith.constant 0 : index
    %c0_75 = arith.constant 0 : index
    %188 = vector.load %arg2[%c23, %c0_74, %c0_75] : memref<25x8x8xf32, #tpu.memory_space<vmem>>, vector<1x8x8xf32>
    %189 = vector.shape_cast %188 : vector<1x8x8xf32> to vector<8x8xf32>
    %cst_76 = arith.constant dense<0.000000e+00> : vector<8x256xf32>
    %190 = tpu.matmul %189, %187, %cst_76 {dimension_numbers = #tpu.dot_dimension_numbers<[1], [0], [0], [1], [0, 0, 1, 1], [], []>} : vector<8x8xf32>, vector<8x256xf32>, vector<8x256xf32> -> vector<8x256xf32>
    %191 = arith.addf %183, %190 : vector<8x256xf32>
    %c222_i32 = arith.constant 222 : i32
    %192 = tpu.dynamic_rotate %1 by %c222_i32 dim 1 : vector<8x256xf32>, i32 -> vector<8x256xf32>
    %193 = vector.extract_strided_slice %2 {offsets = [24, 0], sizes = [1, 256], strides = [1, 1]} : vector<25x256xf32> to vector<1x256xf32>
    %194 = vector.broadcast %193 : vector<1x256xf32> to vector<8x256xf32>
    %195 = arith.mulf %192, %194 : vector<8x256xf32>
    %c24 = arith.constant 24 : index
    %c0_77 = arith.constant 0 : index
    %c0_78 = arith.constant 0 : index
    %196 = vector.load %arg2[%c24, %c0_77, %c0_78] : memref<25x8x8xf32, #tpu.memory_space<vmem>>, vector<1x8x8xf32>
    %197 = vector.shape_cast %196 : vector<1x8x8xf32> to vector<8x8xf32>
    %cst_79 = arith.constant dense<0.000000e+00> : vector<8x256xf32>
    %198 = tpu.matmul %197, %195, %cst_79 {dimension_numbers = #tpu.dot_dimension_numbers<[1], [0], [0], [1], [0, 0, 1, 1], [], []>} : vector<8x8xf32>, vector<8x256xf32>, vector<8x256xf32> -> vector<8x256xf32>
    %199 = arith.addf %191, %198 : vector<8x256xf32>
    %cst_80 = arith.constant dense<0.000000e+00> : vector<8xf32>
    %200 = vector.multi_reduction <add>, %199, %cst_80 [1] : vector<8x256xf32> to vector<8xf32>
    %201 = vector.shape_cast %200 : vector<8xf32> to vector<8x1xf32>
    %cst_81 = arith.constant 3.906250e-03 : f32
    %202 = vector.broadcast %cst_81 : f32 to vector<8x1xf32>
    %203 = arith.mulf %201, %202 : vector<8x1xf32>
    %204 = vector.broadcast %203 : vector<8x1xf32> to vector<8x256xf32>
    %205 = arith.subf %199, %204 : vector<8x256xf32>
    %206 = arith.mulf %205, %205 : vector<8x256xf32>
    %cst_82 = arith.constant dense<0.000000e+00> : vector<8xf32>
    %207 = vector.multi_reduction <add>, %206, %cst_82 [1] : vector<8x256xf32> to vector<8xf32>
    %208 = vector.shape_cast %207 : vector<8xf32> to vector<8x1xf32>
    %cst_83 = arith.constant 3.906250e-03 : f32
    %209 = vector.broadcast %cst_83 : f32 to vector<8x1xf32>
    %210 = arith.mulf %208, %209 : vector<8x1xf32>
    %c0_84 = arith.constant 0 : index
    %c0_85 = arith.constant 0 : index
    %c0_86 = arith.constant 0 : index
    %211 = vector.load %arg4[%c0_84, %c0_85, %c0_86] : memref<1x8x1xf32, #tpu.memory_space<vmem>>, vector<1x8x1xf32>
    %212 = vector.shape_cast %211 : vector<1x8x1xf32> to vector<8x1xf32>
    %cst_87 = arith.constant 9.99999974E-6 : f32
    %213 = vector.broadcast %cst_87 : f32 to vector<8x1xf32>
    %214 = arith.addf %210, %213 : vector<8x1xf32>
    %215 = math.rsqrt %214 : vector<8x1xf32>
    %216 = arith.mulf %212, %215 : vector<8x1xf32>
    %217 = vector.broadcast %216 : vector<8x1xf32> to vector<8x256xf32>
    %218 = arith.mulf %205, %217 : vector<8x256xf32>
    %c0_88 = arith.constant 0 : index
    %c0_89 = arith.constant 0 : index
    %c0_90 = arith.constant 0 : index
    %219 = vector.load %arg5[%c0_88, %c0_89, %c0_90] : memref<1x8x1xf32, #tpu.memory_space<vmem>>, vector<1x8x1xf32>
    %220 = vector.shape_cast %219 : vector<1x8x1xf32> to vector<8x1xf32>
    %221 = vector.broadcast %220 : vector<8x1xf32> to vector<8x256xf32>
    %222 = arith.addf %218, %221 : vector<8x256xf32>
    %cst_91 = arith.constant 0.000000e+00 : f32
    %223 = vector.broadcast %cst_91 : f32 to vector<8x256xf32>
    %224 = arith.maximumf %222, %223 : vector<8x256xf32>
    %225 = arith.addf %1, %224 : vector<8x256xf32>
    %c0_92 = arith.constant 0 : index
    %c0_93 = arith.constant 0 : index
    %c0_94 = arith.constant 0 : index
    %226 = vector.load %arg6[%c0_92, %c0_93, %c0_94] : memref<1x8x256xf32, #tpu.memory_space<vmem>>, vector<1x8x256xf32>
    %227 = vector.shape_cast %226 : vector<1x8x256xf32> to vector<8x256xf32>
    %228 = vector.shape_cast %225 : vector<8x256xf32> to vector<1x8x256xf32>
    tpu.vector_store %arg6[%c0_92, %c0_93, %c0_94], %228 {strides = array<i32>} : memref<1x8x256xf32, #tpu.memory_space<vmem>>, vector<1x8x256xf32>,
    return
  }
  func.func @transform_0(%arg0: i32) -> (i32, i32, i32) {
    %c0_i32 = arith.constant 0 : i32
    %c0_i32_0 = arith.constant 0 : i32
    %c0_i32_1 = arith.constant 0 : i32
    return %arg0, %c0_i32, %c0_i32_0 : i32, i32, i32
  }
  func.func @transform_1(%arg0: i32) -> (i32, i32, i32) {
    %c0_i32 = arith.constant 0 : i32
    %c0_i32_0 = arith.constant 0 : i32
    %c0_i32_1 = arith.constant 0 : i32
    %c0_i32_2 = arith.constant 0 : i32
    return %c0_i32, %c0_i32_0, %c0_i32_1 : i32, i32, i32
  }
  func.func @transform_2(%arg0: i32) -> (i32, i32) {
    %c0_i32 = arith.constant 0 : i32
    %c0_i32_0 = arith.constant 0 : i32
    %c0_i32_1 = arith.constant 0 : i32
    return %c0_i32, %c0_i32_0 : i32, i32
  }
  func.func @transform_3(%arg0: i32) -> (i32, i32, i32) {
    %c0_i32 = arith.constant 0 : i32
    %c0_i32_0 = arith.constant 0 : i32
    %c0_i32_1 = arith.constant 0 : i32
    return %arg0, %c0_i32, %c0_i32_0 : i32, i32, i32
  }
  func.func @transform_4(%arg0: i32) -> (i32, i32, i32) {
    %c0_i32 = arith.constant 0 : i32
    %c0_i32_0 = arith.constant 0 : i32
    %c0_i32_1 = arith.constant 0 : i32
    return %arg0, %c0_i32, %c0_i32_0 : i32, i32, i32
  }
  func.func @transform_5(%arg0: i32) -> (i32, i32, i32) {
    %c0_i32 = arith.constant 0 : i32
    %c0_i32_0 = arith.constant 0 : i32
    %c0_i32_1 = arith.constant 0 : i32
    return %arg0, %c0_i32, %c0_i32_0 : i32, i32, i32
  }
}

</mosaic_0001>

<bundles_post_ra>
// kernel: tpu_custom_call.1
= control target key start
LH: loop header
LB: loop body
LE: loop exit
PB: predicated region body
PF: predicated region fallthrough
CT: control target
= control target key end

     0   :  { %s2592_s20 = smov 127   ;;  %s2593_s21 = smov 33   ;;  %vm70_vm0 = vcmask 64512   ;;  %v2594_v3 = vmov 0.0   ;;  %s3038_s0 = inlined_call_operand.vmem [shape: f32[1,8,256], index: 0, kind: input, shape index: {}]   ;;  %s3039_s1 = inlined_call_operand.vmem [shape: f32[25,8,8], index: 1, kind: input, shape index: {}]   ;;  %s3040_s2 = inlined_call_operand.vmem [shape: f32[25,256], index: 2, kind: input, shape index: {}]   ;;  %s3041_s3 = inlined_call_operand.vmem [shape: f32[1,8,1], index: 3, kind: input, shape index: {}]   ;;  %s3042_s4 = inlined_call_operand.vmem [shape: f32[1,8,1], index: 4, kind: input, shape index: {}]   ;;  %s3043_s5 = inlined_call_operand.hbm [shape: f32[1,8,256], index: 5, kind: output, shape index: {}]  }
   0x1   :  { %v2652_v0 = vld [vmem:[%s3038_s0] sm:$0xff]  ;;  %v2659_v1 = vld [vmem:[%s3038_s0 + $0x8] sm:$0xff]  ;;  %1238 = vmatprep.mubr.f32.mxu0 %v2594_v3  ;;  %138 = vmatprep.mubr.f32.mxu1 %v2594_v3 }
   0x2   :  { %1247 = vrot.lane.b32.xlu1 %v2652_v0, %s2592_s20  ;;  %51 = vrot.lane.b32.xlu0 %v2652_v0, %s2593_s21  ;;  %v2461_v2 = vld [vmem:[%s3039_s1 + $0x60] sm:$0xff] }
   0x3   :  { %1174 = vmatprep.subr.mxu0 %v2659_v1 }
   0x4   :  { %1175 = vmatpush1.msra.mxu0 %v2652_v0 }
   0x5   :  { %2462 = vmatmul.mubr.msk.f32.vlgmr.msra.gmra.mrb[0].mxu0 %vm70_vm0, %v2461_v2 }
   0x6   :  { %1249 = vrot.lane.b32.xlu1 %v2659_v1, %s2592_s20  ;;  %53 = vrot.lane.b32.xlu0 %v2659_v1, %s2593_s21 }
   0x7   :  { %1333 = vmatprep.mubr.f32.mxu0 %v2594_v3 }
   0x8   :  { %10 = vsyncpa [#allocation3], 0  ;;  %s2595_s0 = smov 34   ;;  %s2596_s26 = smov 126   ;;  %v35_v4 = vlaneseq  ;;  %v2723_v7 = vld [vmem:[%s3040_s2 + $0x10] sm:$0xff]  ;;  %v2734_v10 = vld [vmem:[%s3040_s2 + $0x18] sm:$0xff] }
   0x9   :  { %s2597_s27 = smov 32   ;;  %s2598_s28 = smov 114   ;;  %v2739_v11 = vld [vmem:[%s3040_s2 + $0x8] sm:$0xff]  ;;  %v2744_v12 = vld [vmem:[%s3040_s2] sm:$0xff]  ;;  %v2465_v54 = vld [vmem:[%s3039_s1 + $0x70] sm:$0xff] }
   0xa   :  { %33 = vrot.lane.b32.xlu1 %v2659_v1, %s2595_s0  ;;  %31 = vrot.lane.b32.xlu0 %v2652_v0, %s2595_s0  ;;  %s2599_s29 = smov 31   ;;  %s2600_s30 = smov 113   ;;  %v2716_v5 = vshrl.u32 %v35_v4, 7  ;;  %v2718_v6 = vand.u32 127, %v35_v4  ;;  %v2438_v33 = vld [vmem:[%s3039_s1 + $0x8] sm:$0xff]  ;;  %v50_v53 = vld [vmem:[%s3039_s1] sm:$0xff] }
   0xb   :  { %s2601_s6 = smov 30   ;;  %s2602_s7 = smov 112   ;;  %v2463_v34 = vld [vmem:[%s3039_s1 + $0x68] sm:$0xff] }
   0xc   :  { %s2603_s8 = smov 18   ;;  %s2604_s9 = smov 111   ;;  %v2726_v8 = vsub.s32 5, %v2716_v5  ;;  %v2729_v9 = vsub.s32 1, %v2716_v5  ;;  %v2747_v15 = vsub.s32 0, %v2716_v5  ;;  %vm1251_vm1 = vcmp.lt.s32.totalorder %v2718_v6, 127 }
   0xd   :  { %s2605_s10 = smov 17   ;;  %s2606_s11 = smov 110   ;;  %vm55_vm2 = vcmp.lt.s32.totalorder %v2718_v6, 33  ;;  %vm37_vm3 = vcmp.lt.s32.totalorder %v2718_v6, 34  ;;  %v2765_v24 = vsub.s32 6, %v2716_v5  ;;  %vm1346_vm4 = vcmp.lt.s32.totalorder %v2718_v6, 126 }
   0xe   :  { %1344 = vrot.lane.b32.xlu1 %v2659_v1, %s2596_s26  ;;  %1342 = vrot.lane.b32.xlu0 %v2652_v0, %s2596_s26  ;;  %s2607_s12 = smov 16   ;;  %s2608_s13 = smov 98   ;;  %v1257_v16 = vrot.slane %v2723_v7, %v2726_v8  ;;  %v1261_v17 = vrot.slane %v2734_v10, %v2726_v8  ;;  %v65_v18 = vrot.slane %v2739_v11, %v2729_v9  ;;  %v2785_v43 = vsub.s32 2, %v2716_v5 }
   0xf   :  { %s2609_s14 = smov 15   ;;  %s2610_s15 = smov 97   ;;  %v61_v19 = vrot.slane %v2744_v12, %v2729_v9  ;;  %v43_v22 = vrot.slane %v2744_v12, %v2747_v15  ;;  %v47_v23 = vrot.slane %v2739_v11, %v2747_v15  ;;  %v1352_v39 = vrot.slane %v2723_v7, %v2765_v24 }
  0x10   :  { %s2611_s16 = smov 14   ;;  %s2612_s17 = smov 96   ;;  %v1356_v42 = vrot.slane %v2734_v10, %v2765_v24  ;;  %vm223_vm5 = vcmp.lt.s32.totalorder %v2718_v6, 32  ;;  %v2791_v48 = vsub.s32 7, %v2716_v5  ;;  %v229_v51 = vrot.slane %v2744_v12, %v2785_v43 }
  0x11   :  { %s2613_s18 = smov 2   ;;  %s2614_s19 = smov 95   ;;  %v233_v52 = vrot.slane %v2739_v11, %v2785_v43  ;;  %vm1441_vm6 = vcmp.lt.s32.totalorder %v2718_v6, 114  ;;  %v2811_v63 = vsub.s32 3, %v2716_v5  ;;  %vm318_vm7 = vcmp.lt.s32.totalorder %v2718_v6, 31 }
  0x12   :  { %221 = vrot.lane.b32.xlu1 %v2659_v1, %s2597_s27  ;;  %219 = vrot.lane.b32.xlu0 %v2652_v0, %s2597_s27  ;;  %s2615_s20 = smov 1   ;;  %s2616_s21 = smov 94   ;;  %v1447_v59 = vrot.slane %v2723_v7, %v2791_v48  ;;  %v1451_v62 = vrot.slane %v2734_v10, %v2791_v48  ;;  %vm1536_vm8 = vcmp.lt.s32.totalorder %v2718_v6, 113  ;;  %vm413_vm9 = vcmp.lt.s32.totalorder %v2718_v6, 30 }
  0x13   :  { %vm1631_vm10 = vcmp.lt.s32.totalorder %v2718_v6, 112  ;;  %vm508_vm11 = vcmp.lt.s32.totalorder %v2718_v6, 18  ;;  %vm1726_vm12 = vcmp.lt.s32.totalorder %v2718_v6, 111  ;;  %vm603_vm13 = vcmp.lt.s32.totalorder %v2718_v6, 17 }
  0x14   :  { %vm1821_vm14 = vcmp.lt.s32.totalorder %v2718_v6, 110  ;;  %vm698_vm15 = vcmp.lt.s32.totalorder %v2718_v6, 16 }
  0x16   :  { %1439 = vrot.lane.b32.xlu1 %v2659_v1, %s2598_s28  ;;  %1437 = vrot.lane.b32.xlu0 %v2652_v0, %s2598_s28 }
  0x1a   :  { %316 = vrot.lane.b32.xlu1 %v2659_v1, %s2599_s29  ;;  %314 = vrot.lane.b32.xlu0 %v2652_v0, %s2599_s29 }
  0x1e   :  { %1534 = vrot.lane.b32.xlu1 %v2659_v1, %s2600_s30  ;;  %1532 = vrot.lane.b32.xlu0 %v2652_v0, %s2600_s30 }
  0x22   :  { %411 = vrot.lane.b32.xlu1 %v2659_v1, %s2601_s6  ;;  %409 = vrot.lane.b32.xlu0 %v2652_v0, %s2601_s6 }
  0x26   :  { %1629 = vrot.lane.b32.xlu1 %v2659_v1, %s2602_s7  ;;  %1627 = vrot.lane.b32.xlu0 %v2652_v0, %s2602_s7 }
  0x2a   :  { %506 = vrot.lane.b32.xlu1 %v2659_v1, %s2603_s8  ;;  %504 = vrot.lane.b32.xlu0 %v2652_v0, %s2603_s8 }
  0x2e   :  { %1724 = vrot.lane.b32.xlu1 %v2659_v1, %s2604_s9  ;;  %1722 = vrot.lane.b32.xlu0 %v2652_v0, %s2604_s9 }
  0x32   :  { %601 = vrot.lane.b32.xlu1 %v2659_v1, %s2605_s10  ;;  %599 = vrot.lane.b32.xlu0 %v2652_v0, %s2605_s10  ;;  %s2618_s10 = smov [#allocation2]  }
  0x36   :  { %1819 = vrot.lane.b32.xlu1 %v2659_v1, %s2606_s11  ;;  %1817 = vrot.lane.b32.xlu0 %v2652_v0, %s2606_s11 }
  0x3a   :  { %696 = vrot.lane.b32.xlu1 %v2659_v1, %s2607_s12  ;;  %694 = vrot.lane.b32.xlu0 %v2652_v0, %s2607_s12 }
  0x3e   :  { %1914 = vrot.lane.b32.xlu1 %v2659_v1, %s2608_s13  ;;  %1912 = vrot.lane.b32.xlu0 %v2652_v0, %s2608_s13 }
  0x42   :  { %791 = vrot.lane.b32.xlu1 %v2659_v1, %s2609_s14  ;;  %789 = vrot.lane.b32.xlu0 %v2652_v0, %s2609_s14 }
  0x46   :  { %2009 = vrot.lane.b32.xlu1 %v2659_v1, %s2610_s15  ;;  %2007 = vrot.lane.b32.xlu0 %v2652_v0, %s2610_s15 }
  0x4a   :  { %886 = vrot.lane.b32.xlu1 %v2659_v1, %s2611_s16  ;;  %884 = vrot.lane.b32.xlu0 %v2652_v0, %s2611_s16 }
  0x4e   :  { %2104 = vrot.lane.b32.xlu1 %v2659_v1, %s2612_s17  ;;  %2102 = vrot.lane.b32.xlu0 %v2652_v0, %s2612_s17 }
  0x52   :  { %981 = vrot.lane.b32.xlu1 %v2659_v1, %s2613_s18  ;;  %979 = vrot.lane.b32.xlu0 %v2652_v0, %s2613_s18 }
  0x56   :  { %2199 = vrot.lane.b32.xlu1 %v2659_v1, %s2614_s19  ;;  %2197 = vrot.lane.b32.xlu0 %v2652_v0, %s2614_s19 }
  0x5a   :  { %1076 = vrot.lane.b32.xlu1 %v2659_v1, %s2615_s20  ;;  %1074 = vrot.lane.b32.xlu0 %v2652_v0, %s2615_s20 }
  0x5e   :  { %2294 = vrot.lane.b32.xlu1 %v2659_v1, %s2616_s21  ;;  %2292 = vrot.lane.b32.xlu0 %v2652_v0, %s2616_s21 }
  0x74   :  { %v1248_v13 = vpop.permute.xlu1 %1247  ;;  %v52_v14 = vpop.permute.xlu0 %51 }
  0x78   :  { %v1250_v20 = vpop.permute.xlu1 %1249  ;;  %v54_v21 = vpop.permute.xlu0 %53 }
  0x79   :  { %v1252_v25 = vsel %vm1251_vm1, %v1248_v13, %v1250_v20  ;;  %v1253_v26 = vsel %vm1251_vm1, %v1250_v20, %v1248_v13  ;;  %v57_v27 = vsel %vm55_vm2, %v54_v21, %v52_v14  ;;  %v56_v28 = vsel %vm55_vm2, %v52_v14, %v54_v21  ;;  %v2823_v20 = vld [vmem:[%s3040_s2 + $0x20] sm:$0xff]  ;;  %v2441_v21 = vld [vmem:[%s3039_s1 + $0x10] sm:$0xff] }
  0x7a   :  { %v1262_v29 = vmul.f32 %v1257_v16, %v1252_v25  ;;  %v1263_v30 = vmul.f32 %v1261_v17, %v1253_v26  ;;  %v67_v31 = vmul.f32 %v65_v18, %v56_v28  ;;  %v66_v32 = vmul.f32 %v61_v19, %v57_v27 }
  0x7b   :  { %v324_v18 = vrot.slane %v2744_v12, %v2811_v63  ;;  %v328_v19 = vrot.slane %v2739_v11, %v2811_v63  ;;  %vm1916_vm1 = vcmp.lt.s32.totalorder %v2718_v6, 98  ;;  %vm793_vm2 = vcmp.lt.s32.totalorder %v2718_v6, 15 }
  0x7c   :  { %v34_v35 = vpop.permute.xlu1 %33  ;;  %74 = vmatprep.subr.mxu1 %v67_v31  ;;  %v32_v36 = vpop.permute.xlu0 %31  ;;  %1269 = vmatprep.subr.mxu0 %v1263_v30 }
  0x7d   :  { %v38_v37 = vsel %vm37_vm3, %v32_v36, %v34_v35  ;;  %v39_v38 = vsel %vm37_vm3, %v34_v35, %v32_v36  ;;  %75 = vmatpush1.msra.mxu1 %v66_v32  ;;  %1270 = vmatpush1.msra.mxu0 %v1262_v29  ;;  %v1542_v29 = vrot.slane %v2823_v20, %v2747_v15  ;;  %vm2011_vm3 = vcmp.lt.s32.totalorder %v2718_v6, 97 }
  0x7e   :  { %v48_v40 = vmul.f32 %v43_v22, %v39_v38  ;;  %v49_v41 = vmul.f32 %v47_v23, %v38_v37  ;;  %2439 = vmatmul.mubr.msk.f32.vlgmr.msra.gmra.mrb[0].mxu1 %vm70_vm0, %v2438_v33  ;;  %2464 = vmatmul.mubr.msk.f32.vlgmr.msra.gmra.mrb[0].mxu0 %vm70_vm0, %v2463_v34  ;;  %v2467_v22 = vld [vmem:[%s3039_s1 + $0x78] sm:$0xff]  ;;  %v2834_v23 = vld [vmem:[%s3040_s2 + $0x28] sm:$0xff]  ;;  %v2844_v33 = vsub.s32 4, %v2716_v5 }
  0x7f   :  { %212 = vmatprep.mubr.f32.mxu1 %v2594_v3  ;;  %1428 = vmatprep.mubr.f32.mxu0 %v2594_v3  ;;  %v1546_v32 = vrot.slane %v2834_v23, %v2747_v15 }
  0x80   :  { %v1345_v44 = vpop.permute.xlu1 %1344  ;;  %148 = vmatprep.subr.mxu1 %v49_v41  ;;  %v1343_v45 = vpop.permute.xlu0 %1342  ;;  %v423_v5 = vrot.slane %v2739_v11, %v2844_v33  ;;  %v2443_v41 = vld [vmem:[%s3039_s1 + $0x18] sm:$0xff] }
  0x81   :  { %v1347_v46 = vsel %vm1346_vm4, %v1343_v45, %v1345_v44  ;;  %v1348_v47 = vsel %vm1346_vm4, %v1345_v44, %v1343_v45  ;;  %149 = vmatpush1.msra.mxu1 %v48_v40  ;;  %v419_v40 = vrot.slane %v2744_v12, %v2844_v33  ;;  %vm888_vm4 = vcmp.lt.s32.totalorder %v2718_v6, 14 }
  0x82   :  { %v1357_v49 = vmul.f32 %v1352_v39, %v1347_v46  ;;  %v1358_v50 = vmul.f32 %v1356_v42, %v1348_v47  ;;  %v2469_v42 = vld [vmem:[%s3039_s1 + $0x80] sm:$0xff] }
  0x84   :  { %v222_v55 = vpop.permute.xlu1 %221  ;;  %v220_v56 = vpop.permute.xlu0 %219  ;;  %1364 = vmatprep.subr.mxu0 %v1358_v50 }
  0x85   :  { %v224_v57 = vsel %vm223_vm5, %v220_v56, %v222_v55  ;;  %v225_v58 = vsel %vm223_vm5, %v222_v55, %v220_v56  ;;  %1365 = vmatpush1.msra.mxu0 %v1357_v49  ;;  %v1637_v49 = vrot.slane %v2823_v20, %v2729_v9  ;;  %vm2106_vm5 = vcmp.lt.s32.totalorder %v2718_v6, 96 }
  0x86   :  { %v234_v60 = vmul.f32 %v229_v51, %v225_v58  ;;  %v235_v61 = vmul.f32 %v233_v52, %v224_v57  ;;  %2440 = vmatmul.mubr.msk.f32.vlgmr.msra.gmra.mrb[0].mxu1 %vm70_vm0, %v50_v53  ;;  %2466 = vmatmul.mubr.msk.f32.vlgmr.msra.gmra.mrb[0].mxu0 %vm70_vm0, %v2465_v54  ;;  %v1641_v52 = vrot.slane %v2834_v23, %v2729_v9 }
  0x87   :  { %305 = vmatprep.mubr.f32.mxu1 %v2594_v3  ;;  %1523 = vmatprep.mubr.f32.mxu0 %v2594_v3 }
  0x88   :  { %v1440_v2 = vpop.permute.xlu1 %1439  ;;  %241 = vmatprep.subr.mxu1 %v235_v61  ;;  %v1438_v4 = vpop.permute.xlu0 %1437  ;;  %v2445_v61 = vld [vmem:[%s3039_s1 + $0x20] sm:$0xff] }
  0x89   :  { %v1442_v13 = vsel %vm1441_vm6, %v1438_v4, %v1440_v2  ;;  %v1443_v14 = vsel %vm1441_vm6, %v1440_v2, %v1438_v4  ;;  %242 = vmatpush1.msra.mxu1 %v234_v60  ;;  %v518_v60 = vrot.slane %v2739_v11, %v2726_v8  ;;  %vm983_vm6 = vcmp.lt.s32.totalorder %v2718_v6, 2 }
  0x8a   :  { %v1452_v16 = vmul.f32 %v1447_v59, %v1442_v13  ;;  %v1453_v17 = vmul.f32 %v1451_v62, %v1443_v14  ;;  %v514_v59 = vrot.slane %v2744_v12, %v2726_v8  ;;  %v2471_v62 = vld [vmem:[%s3039_s1 + $0x88] sm:$0xff] }
  0x8c   :  { %v317_v25 = vpop.permute.xlu1 %316  ;;  %v315_v26 = vpop.permute.xlu0 %314  ;;  %1459 = vmatprep.subr.mxu0 %v1453_v17 }
  0x8d   :  { %v319_v27 = vsel %vm318_vm7, %v315_v26, %v317_v25  ;;  %v320_v28 = vsel %vm318_vm7, %v317_v25, %v315_v26  ;;  %1460 = vmatpush1.msra.mxu0 %v1452_v16  ;;  %v1732_v16 = vrot.slane %v2823_v20, %v2785_v43  ;;  %vm2201_vm7 = vcmp.lt.s32.totalorder %v2718_v6, 95 }
  0x8e   :  { %v329_v30 = vmul.f32 %v324_v18, %v320_v28  ;;  %v330_v31 = vmul.f32 %v328_v19, %v319_v27  ;;  %2442 = vmatmul.mubr.msk.f32.vlgmr.msra.gmra.mrb[0].mxu1 %vm70_vm0, %v2441_v21  ;;  %2468 = vmatmul.mubr.msk.f32.vlgmr.msra.gmra.mrb[0].mxu0 %vm70_vm0, %v2467_v22  ;;  %v1736_v19 = vrot.slane %v2834_v23, %v2785_v43 }
  0x8f   :  { %400 = vmatprep.mubr.f32.mxu1 %v2594_v3  ;;  %1618 = vmatprep.mubr.f32.mxu0 %v2594_v3 }
  0x90   :  { %v1535_v34 = vpop.permute.xlu1 %1534  ;;  %336 = vmatprep.subr.mxu1 %v330_v31  ;;  %v1533_v35 = vpop.permute.xlu0 %1532  ;;  %v2447_v31 = vld [vmem:[%s3039_s1 + $0x28] sm:$0xff] }
  0x91   :  { %v1537_v36 = vsel %vm1536_vm8, %v1533_v35, %v1535_v34  ;;  %v1538_v37 = vsel %vm1536_vm8, %v1535_v34, %v1533_v35  ;;  %337 = vmatpush1.msra.mxu1 %v329_v30  ;;  %v613_v30 = vrot.slane %v2739_v11, %v2765_v24  ;;  %vm1078_vm8 = vcmp.lt.s32.totalorder %v2718_v6, 1 }
  0x92   :  { %v1547_v38 = vmul.f32 %v1542_v29, %v1537_v36  ;;  %v1548_v39 = vmul.f32 %v1546_v32, %v1538_v37  ;;  %v609_v29 = vrot.slane %v2744_v12, %v2765_v24  ;;  %v2473_v32 = vld [vmem:[%s3039_s1 + $0x90] sm:$0xff] }
  0x94   :  { %v412_v44 = vpop.permute.xlu1 %411  ;;  %v410_v45 = vpop.permute.xlu0 %409  ;;  %1554 = vmatprep.subr.mxu0 %v1548_v39 }
  0x95   :  { %v414_v46 = vsel %vm413_vm9, %v410_v45, %v412_v44  ;;  %v415_v47 = vsel %vm413_vm9, %v412_v44, %v410_v45  ;;  %1555 = vmatpush1.msra.mxu0 %v1547_v38  ;;  %v1827_v38 = vrot.slane %v2823_v20, %v2811_v63  ;;  %vm2296_vm9 = vcmp.lt.s32.totalorder %v2718_v6, 94 }
  0x96   :  { %v424_v50 = vmul.f32 %v419_v40, %v415_v47  ;;  %v425_v51 = vmul.f32 %v423_v5, %v414_v46  ;;  %2444 = vmatmul.mubr.msk.f32.vlgmr.msra.gmra.mrb[0].mxu1 %vm70_vm0, %v2443_v41  ;;  %2470 = vmatmul.mubr.msk.f32.vlgmr.msra.gmra.mrb[0].mxu0 %vm70_vm0, %v2469_v42  ;;  %v1831_v5 = vrot.slane %v2834_v23, %v2811_v63 }
  0x97   :  { %495 = vmatprep.mubr.f32.mxu1 %v2594_v3  ;;  %1713 = vmatprep.mubr.f32.mxu0 %v2594_v3 }
  0x98   :  { %v1630_v53 = vpop.permute.xlu1 %1629  ;;  %431 = vmatprep.subr.mxu1 %v425_v51  ;;  %v1628_v54 = vpop.permute.xlu0 %1627  ;;  %v2449_v51 = vld [vmem:[%s3039_s1 + $0x30] sm:$0xff] }
  0x99   :  { %v1632_v55 = vsel %vm1631_vm10, %v1628_v54, %v1630_v53  ;;  %v1633_v56 = vsel %vm1631_vm10, %v1630_v53, %v1628_v54  ;;  %432 = vmatpush1.msra.mxu1 %v424_v50  ;;  %v708_v50 = vrot.slane %v2739_v11, %v2791_v48  ;;  %v1926_v11 = vrot.slane %v2834_v23, %v2844_v33 }
  0x9a   :  { %v1642_v57 = vmul.f32 %v1637_v49, %v1632_v55  ;;  %v1643_v58 = vmul.f32 %v1641_v52, %v1633_v56  ;;  %v704_v49 = vrot.slane %v2744_v12, %v2791_v48  ;;  %v2475_v52 = vld [vmem:[%s3039_s1 + $0x98] sm:$0xff]  ;;  %v1922_v12 = vrot.slane %v2823_v20, %v2844_v33 }
  0x9b   :  { %v803_v33 = vrot.slane %v2734_v10, %v2747_v15 }
  0x9c   :  { %v507_v2 = vpop.permute.xlu1 %506  ;;  %v505_v4 = vpop.permute.xlu0 %504  ;;  %1649 = vmatprep.subr.mxu0 %v1643_v58 }
  0x9d   :  { %v509_v13 = vsel %vm508_vm11, %v505_v4, %v507_v2  ;;  %v510_v14 = vsel %vm508_vm11, %v507_v2, %v505_v4  ;;  %1650 = vmatpush1.msra.mxu0 %v1642_v57 }
  0x9e   :  { %v519_v17 = vmul.f32 %v514_v59, %v510_v14  ;;  %v520_v18 = vmul.f32 %v518_v60, %v509_v13  ;;  %2446 = vmatmul.mubr.msk.f32.vlgmr.msra.gmra.mrb[0].mxu1 %vm70_vm0, %v2445_v61  ;;  %2472 = vmatmul.mubr.msk.f32.vlgmr.msra.gmra.mrb[0].mxu0 %vm70_vm0, %v2471_v62  ;;  %v799_v13 = vrot.slane %v2723_v7, %v2747_v15  ;;  %v2451_v14 = vld [vmem:[%s3039_s1 + $0x38] sm:$0xff] }
  0x9f   :  { %590 = vmatprep.mubr.f32.mxu1 %v2594_v3  ;;  %1808 = vmatprep.mubr.f32.mxu0 %v2594_v3  ;;  %v2021_v15 = vrot.slane %v2834_v23, %v2726_v8 }
  0xa0   :  { %v1725_v21 = vpop.permute.xlu1 %1724  ;;  %526 = vmatprep.subr.mxu1 %v520_v18  ;;  %v1723_v22 = vpop.permute.xlu0 %1722 }
  0xa1   :  { %v1727_v25 = vsel %vm1726_vm12, %v1723_v22, %v1725_v21  ;;  %v1728_v26 = vsel %vm1726_vm12, %v1725_v21, %v1723_v22  ;;  %527 = vmatpush1.msra.mxu1 %v519_v17  ;;  %v2017_v22 = vrot.slane %v2823_v20, %v2726_v8  ;;  %v898_v8 = vrot.slane %v2734_v10, %v2729_v9 }
  0xa2   :  { %v1737_v27 = vmul.f32 %v1732_v16, %v1727_v25  ;;  %v1738_v28 = vmul.f32 %v1736_v19, %v1728_v26  ;;  %v2477_v16 = vld [vmem:[%s3039_s1 + $0xa0] sm:$0xff] }
  0xa4   :  { %v602_v34 = vpop.permute.xlu1 %601  ;;  %v600_v35 = vpop.permute.xlu0 %599  ;;  %1744 = vmatprep.subr.mxu0 %v1738_v28 }
  0xa5   :  { %v604_v36 = vsel %vm603_vm13, %v600_v35, %v602_v34  ;;  %v605_v37 = vsel %vm603_vm13, %v602_v34, %v600_v35  ;;  %1745 = vmatpush1.msra.mxu0 %v1737_v27  ;;  %v894_v34 = vrot.slane %v2723_v7, %v2729_v9  ;;  %v2453_v35 = vld [vmem:[%s3039_s1 + $0x40] sm:$0xff]  ;;  %v2116_v9 = vrot.slane %v2834_v23, %v2765_v24 }
  0xa6   :  { %v614_v39 = vmul.f32 %v609_v29, %v605_v37  ;;  %v615_v40 = vmul.f32 %v613_v30, %v604_v36  ;;  %2448 = vmatmul.mubr.msk.f32.vlgmr.msra.gmra.mrb[0].mxu1 %vm70_vm0, %v2447_v31  ;;  %2474 = vmatmul.mubr.msk.f32.vlgmr.msra.gmra.mrb[0].mxu0 %vm70_vm0, %v2473_v32  ;;  %v2479_v36 = vld [vmem:[%s3039_s1 + $0xa8] sm:$0xff] }
  0xa7   :  { %685 = vmatprep.mubr.f32.mxu1 %v2594_v3  ;;  %1903 = vmatprep.mubr.f32.mxu0 %v2594_v3 }
  0xa8   :  { %v1820_v41 = vpop.permute.xlu1 %1819  ;;  %621 = vmatprep.subr.mxu1 %v615_v40  ;;  %v1818_v42 = vpop.permute.xlu0 %1817 }
  0xa9   :  { %v1822_v44 = vsel %vm1821_vm14, %v1818_v42, %v1820_v41  ;;  %v1823_v45 = vsel %vm1821_vm14, %v1820_v41, %v1818_v42  ;;  %622 = vmatpush1.msra.mxu1 %v614_v39 }
  0xaa   :  { %v1832_v46 = vmul.f32 %v1827_v38, %v1822_v44  ;;  %v1833_v47 = vmul.f32 %v1831_v5, %v1823_v45  ;;  %v2112_v5 = vrot.slane %v2823_v20, %v2765_v24  ;;  %v993_v24 = vrot.slane %v2734_v10, %v2785_v43 }
  0xac   :  { %v697_v53 = vpop.permute.xlu1 %696  ;;  %v695_v54 = vpop.permute.xlu0 %694  ;;  %1839 = vmatprep.subr.mxu0 %v1833_v47 }
  0xad   :  { %v699_v55 = vsel %vm698_vm15, %v695_v54, %v697_v53  ;;  %v700_v56 = vsel %vm698_vm15, %v697_v53, %v695_v54  ;;  %1840 = vmatpush1.msra.mxu0 %v1832_v46  ;;  %v2481_v53 = vld [vmem:[%s3039_s1 + $0xb0] sm:$0xff] }
  0xae   :  { %v709_v57 = vmul.f32 %v704_v49, %v700_v56  ;;  %v710_v58 = vmul.f32 %v708_v50, %v699_v55  ;;  %2450 = vmatmul.mubr.msk.f32.vlgmr.msra.gmra.mrb[0].mxu1 %vm70_vm0, %v2449_v51  ;;  %2476 = vmatmul.mubr.msk.f32.vlgmr.msra.gmra.mrb[0].mxu0 %vm70_vm0, %v2475_v52  ;;  %v989_v51 = vrot.slane %v2723_v7, %v2785_v43  ;;  %v2455_v52 = vld [vmem:[%s3039_s1 + $0x48] sm:$0xff] }
  0xaf   :  { %780 = vmatprep.mubr.f32.mxu1 %v2594_v3  ;;  %1998 = vmatprep.mubr.f32.mxu0 %v2594_v3  ;;  %v2211_v43 = vrot.slane %v2834_v23, %v2791_v48  ;;  %v2457_v23 = vld [vmem:[%s3039_s1 + $0x50] sm:$0xff] }
  0xb0   :  { %v1915_v59 = vpop.permute.xlu1 %1914  ;;  %716 = vmatprep.subr.mxu1 %v710_v58  ;;  %v1913_v60 = vpop.permute.xlu0 %1912 }
  0xb1   :  { %v1917_v61 = vsel %vm1916_vm1, %v1913_v60, %v1915_v59  ;;  %v1918_v62 = vsel %vm1916_vm1, %v1915_v59, %v1913_v60  ;;  %717 = vmatpush1.msra.mxu1 %v709_v57  ;;  %v2207_v57 = vrot.slane %v2823_v20, %v2791_v48  ;;  %v1088_v48 = vrot.slane %v2734_v10, %v2811_v63  ;;  %v2486_v10 = vld [vmem:[%s3040_s2 + $0x38] ss:$0 sm:$0xff] }
  0xb2   :  { %v1927_v2 = vmul.f32 %v1922_v12, %v1917_v61  ;;  %v1928_v4 = vmul.f32 %v1926_v11, %v1918_v62 }
  0xb4   :  { %v792_v17 = vpop.permute.xlu1 %791  ;;  %v790_v18 = vpop.permute.xlu0 %789  ;;  %1934 = vmatprep.subr.mxu0 %v1928_v4  ;;  %v1084_v4 = vrot.slane %v2723_v7, %v2811_v63  ;;  %v2485_v7 = vld [vmem:[%s3040_s2 + $0x30] ss:$0 sm:$0xff] }
  0xb5   :  { %v794_v19 = vsel %vm793_vm2, %v790_v18, %v792_v17  ;;  %v795_v21 = vsel %vm793_vm2, %v792_v17, %v790_v18  ;;  %1935 = vmatpush1.msra.mxu0 %v1927_v2 }
  0xb6   :  { %v804_v25 = vmul.f32 %v799_v13, %v795_v21  ;;  %v805_v26 = vmul.f32 %v803_v33, %v794_v19  ;;  %2452 = vmatmul.mubr.msk.f32.vlgmr.msra.gmra.mrb[0].mxu1 %vm70_vm0, %v2451_v14  ;;  %2478 = vmatmul.mubr.msk.f32.vlgmr.msra.gmra.mrb[0].mxu0 %vm70_vm0, %v2477_v16  ;;  %v2483_v13 = vld [vmem:[%s3039_s1 + $0xb8] sm:$0xff] }
  0xb7   :  { %875 = vmatprep.mubr.f32.mxu1 %v2594_v3  ;;  %2093 = vmatprep.mubr.f32.mxu0 %v2594_v3 }
  0xb8   :  { %v2010_v27 = vpop.permute.xlu1 %2009  ;;  %811 = vmatprep.subr.mxu1 %v805_v26  ;;  %v2008_v28 = vpop.permute.xlu0 %2007 }
  0xb9   :  { %v2012_v29 = vsel %vm2011_vm3, %v2008_v28, %v2010_v27  ;;  %v2013_v30 = vsel %vm2011_vm3, %v2010_v27, %v2008_v28  ;;  %812 = vmatpush1.msra.mxu1 %v804_v25  ;;  %v2487_v27 = vld [vmem:[%s3039_s1 + $0xc0] sm:$0xff] }
  0xba   :  { %v2022_v31 = vmul.f32 %v2017_v22, %v2012_v29  ;;  %v2023_v32 = vmul.f32 %v2021_v15, %v2013_v30  ;;  %v2459_v15 = vld [vmem:[%s3039_s1 + $0x58] sm:$0xff] }
  0xbc   :  { %v887_v37 = vpop.permute.xlu1 %886  ;;  %v885_v38 = vpop.permute.xlu0 %884  ;;  %2029 = vmatprep.subr.mxu0 %v2023_v32 }
  0xbd   :  { %v889_v39 = vsel %vm888_vm4, %v885_v38, %v887_v37  ;;  %v890_v40 = vsel %vm888_vm4, %v887_v37, %v885_v38  ;;  %2030 = vmatpush1.msra.mxu0 %v2022_v31 }
  0xbe   :  { %v899_v41 = vmul.f32 %v894_v34, %v890_v40  ;;  %v900_v42 = vmul.f32 %v898_v8, %v889_v39  ;;  %2454 = vmatmul.mubr.msk.f32.vlgmr.msra.gmra.mrb[0].mxu1 %vm70_vm0, %v2453_v35  ;;  %2480 = vmatmul.mubr.msk.f32.vlgmr.msra.gmra.mrb[0].mxu0 %vm70_vm0, %v2479_v36 }
  0xbf   :  { %970 = vmatprep.mubr.f32.mxu1 %v2594_v3  ;;  %2188 = vmatprep.mubr.f32.mxu0 %v2594_v3 }
  0xc0   :  { %v2105_v44 = vpop.permute.xlu1 %2104  ;;  %906 = vmatprep.subr.mxu1 %v900_v42  ;;  %v2103_v45 = vpop.permute.xlu0 %2102 }
  0xc1   :  { %v2107_v46 = vsel %vm2106_vm5, %v2103_v45, %v2105_v44  ;;  %v2108_v47 = vsel %vm2106_vm5, %v2105_v44, %v2103_v45  ;;  %907 = vmatpush1.msra.mxu1 %v899_v41  ;;  %v2410_v41 = vld [vmem:[%s3042_s4] sm:$0xff]  ;;  %s2430_s4 = sshll.u32 %s2618_s10, 4  ;;  %s2431_s4 = int_to_ptr.vmem [resolvable:$true] %s2430_s4 }
  0xc2   :  { %v2117_v49 = vmul.f32 %v2112_v5, %v2107_v46  ;;  %v2118_v50 = vmul.f32 %v2116_v9, %v2108_v47  ;;  %v2617_v5 = vmov 0   ;;  %v2399_v45 = vld [vmem:[%s3041_s3] sm:$0xff]  ;;  %s2568_s3 = scalar_lea.vmem %s2431_s4, 256  ;;  %p2573_p1 = scmp.lt.s32.totalorder %s2431_s4, %s2431_s4 }
  0xc3   :  { %2564 = vset.pattern.permute.xlu0 %v2617_v5  ;;  %2565 = vset.pattern.permute.xlu1 %v2617_v5  ;;  %p2569_p0 = scmp.ne.s32.totalorder %s2431_s4, %s2568_s3  ;;  %p2574_p2 = scmp.lt.s32.totalorder %s2568_s3, %s2568_s3 }
  0xc4   :  { %v982_v54 = vpop.permute.xlu1 %981  ;;  %v980_v55 = vpop.permute.xlu0 %979  ;;  %2124 = vmatprep.subr.mxu0 %v2118_v50 }
  0xc5   :  { %v984_v56 = vsel %vm983_vm6, %v980_v55, %v982_v54  ;;  %v985_v12 = vsel %vm983_vm6, %v982_v54, %v980_v55  ;;  %2125 = vmatpush1.msra.mxu0 %v2117_v49  ;;  %p2575_p3 = por %p2574_p2, %p2573_p1 }
  0xc6   :  { %v994_v58 = vmul.f32 %v989_v51, %v985_v12  ;;  %v995_v11 = vmul.f32 %v993_v24, %v984_v56  ;;  %2456 = vmatmul.mubr.msk.f32.vlgmr.msra.gmra.mrb[0].mxu1 %vm70_vm0, %v2455_v52  ;;  %2482 = vmatmul.mubr.msk.f32.vlgmr.msra.gmra.mrb[0].mxu0 %vm70_vm0, %v2481_v53 }
  0xc7   :  { %1065 = vmatprep.mubr.f32.mxu1 %v2594_v3  ;;  %2283 = vmatprep.mubr.f32.mxu0 %v2594_v3  ;;  %p2576_p4 = pnand %p2575_p3, %p2569_p0 }
  0xc8   :  { %v2200_v59 = vpop.permute.xlu1 %2199  ;;  %1001 = vmatprep.subr.mxu1 %v995_v11  ;;  %v2198_v60 = vpop.permute.xlu0 %2197 }
  0xc9   :  { %v2202_v61 = vsel %vm2201_vm7, %v2198_v60, %v2200_v59  ;;  %v2203_v20 = vsel %vm2201_vm7, %v2200_v59, %v2198_v60  ;;  %1002 = vmatpush1.msra.mxu1 %v994_v58 }
  0xca   :  { %v2212_v62 = vmul.f32 %v2207_v57, %v2202_v61  ;;  %v2213_v2 = vmul.f32 %v2211_v43, %v2203_v20 }
  0xcc   :  { %v1077_v33 = vpop.permute.xlu1 %1076  ;;  %v1075_v14 = vpop.permute.xlu0 %1074  ;;  %2219 = vmatprep.subr.mxu0 %v2213_v2 }
  0xcd   :  { %v1079_v16 = vsel %vm1078_vm8, %v1075_v14, %v1077_v33  ;;  %v1080_v17 = vsel %vm1078_vm8, %v1077_v33, %v1075_v14  ;;  %2220 = vmatpush1.msra.mxu0 %v2212_v62 }
  0xce   :  { %v1089_v18 = vmul.f32 %v1084_v4, %v1080_v17  ;;  %v1090_v19 = vmul.f32 %v1088_v48, %v1079_v16  ;;  %2458 = vmatmul.mubr.msk.f32.vlgmr.msra.gmra.mrb[0].mxu1 %vm70_vm0, %v2457_v23  ;;  %2484 = vmatmul.mubr.msk.f32.vlgmr.msra.gmra.mrb[0].mxu0 %vm70_vm0, %v2483_v13 }
  0xcf   :  { %1160 = vmatprep.mubr.f32.mxu1 %v2594_v3  ;;  %2378 = vmatprep.mubr.f32.mxu0 %v2594_v3 }
  0xd0   :  { %v2295_v63 = vpop.permute.xlu1 %2294  ;;  %1096 = vmatprep.subr.mxu1 %v1090_v19  ;;  %v2293_v21 = vpop.permute.xlu0 %2292 }
  0xd1   :  { %v2297_v22 = vsel %vm2296_vm9, %v2293_v21, %v2295_v63  ;;  %v2298_v25 = vsel %vm2296_vm9, %v2295_v63, %v2293_v21  ;;  %1097 = vmatpush1.msra.mxu1 %v1089_v18 }
  0xd2   :  { %v2307_v26 = vmul.f32 %v2485_v7, %v2297_v22  ;;  %v2308_v6 = vmul.f32 %v2486_v10, %v2298_v25 }
  0xd4   :  { %2314 = vmatprep.subr.mxu0 %v2308_v6 }
  0xd5   :  { %2315 = vmatpush1.msra.mxu0 %v2307_v26 }
  0xd6   :  { %2460 = vmatmul.mubr.msk.f32.vlgmr.msra.gmra.mrb[0].mxu1 %vm70_vm0, %v2459_v15  ;;  %2488 = vmatmul.mubr.msk.f32.vlgmr.msra.gmra.mrb[0].mxu0 %vm70_vm0, %v2487_v27 }
 0x1a9   :  { %v1162_v3 = vpop.f32.mrb[0].mxu1  ;;  %v2380_v28 = vpop.f32.mrb[0].mxu0 }
 0x1aa   :  { %v2489_v29 = vadd.f32 %v2380_v28, %v1162_v3  ;;  %v1164_v30 = vpop.f32.mrb[1].mxu1  ;;  %v2382_v31 = vpop.f32.mrb[1].mxu0 }
 0x1ab   :  { %v2490_v32 = vadd.f32 %v2382_v31, %v1164_v30 }
 0x1ad   :  { %v2387_v34 = vadd.f32 %v2490_v32, %v2489_v29 }
 0x1af   :  { %2388 = vadd.xlane.f32.xlu0 %v2387_v34 }
 0x23c   :  { %v2389_v8 = vpop.xlane.xlu0 %2388 }
 0x23d   :  { %v2390_v35 = vmul.f32 0.00390625, %v2389_v8 }
 0x23f   :  { %v2391_v36 = vsub.f32 %v2489_v29, %v2390_v35  ;;  %v2392_v37 = vsub.f32 %v2490_v32, %v2390_v35 }
 0x241   :  { %v2393_v38 = vmul.f32 %v2391_v36, %v2391_v36  ;;  %v2394_v39 = vmul.f32 %v2392_v37, %v2392_v37 }
 0x243   :  { %v2395_v40 = vadd.f32 %v2394_v39, %v2393_v38 }
 0x245   :  { %2396 = vadd.xlane.f32.xlu1 %v2395_v40 }
 0x256   :  { %2413 = vperm.xlu1 %2565, %v2410_v41  }
 0x2d2   :  { %v2397_v42 = vpop.xlane.xlu1 %2396 }
 0x2d3   :  { %v2398_v9 = vmul.f32 0.00390625, %v2397_v42 }
 0x2d5   :  { %v2400_v44 = vadd.f32 1e-05, %v2398_v9 }
 0x2d6   :  { %v2414_v50 = vpop.permute.xlu1 %2413 }
 0x2d7   :  { %2566 = vrsqrt.f32 %v2400_v44 }
 0x2e1   :  { %v2567_v46 = vpop.eup %2566 }
 0x2e2   :  { %v2402_v47 = vmul.f32 %v2567_v46, %v2399_v45 }
 0x2e4   :  { %2405 = vperm.xlu0 %2564, %v2402_v47  }
 0x363   :  { %v2406_v49 = vpop.permute.xlu0 %2405 }
 0x364   :  { %v2408_v51 = vmul.f32 %v2406_v49, %v2391_v36  ;;  %v2409_v24 = vmul.f32 %v2406_v49, %v2392_v37 }
 0x366   :  { %v2416_v52 = vadd.f32 %v2414_v50, %v2408_v51  ;;  %v2417_v53 = vadd.f32 %v2414_v50, %v2409_v24 }
 0x368   :  { %v2418_v54 = vmax.f32 %v2416_v52, 0.0  ;;  %v2419_v55 = vmax.f32 %v2417_v53, 0.0 }
 0x36a   :  { %v2420_v56 = vadd.f32 %v2418_v54, %v2652_v0  ;;  %v2421_v12 = vadd.f32 %v2419_v55, %v2659_v1 }
 0x36c   :  { %2422 = vst [vmem:[#allocation2] sm:$0xff] %v2420_v56  ;;  %2423 = vst [vmem:[#allocation2 + $0x8] sm:$0xff] %v2421_v12 }
 0x36d   :  { %2579 = shalt.err (!%p2576_p4)
}
 0x36e   :  { %s2580_s13 = scalar_lea.hbm %s3043_s5, 256 }
 0x36f   :  { %p2581_p5 = scmp.ne.s32.totalorder %s3043_s5, %s2580_s13  ;;  %p2584_p6 = scmp.lt.u32.totalorder %s2580_s13, %s3043_s5 }
 0x371   :  { %p2586_p7 = pnand %p2584_p6, %p2581_p5 }
 0x373   :  { %2589 = shalt.err (!%p2586_p7)
}
 0x374   :  { %2433 = dma.vmem_to_hbm [thread:$0]  %s2431_s4, 256, %s3043_s5, [#allocation3]  }
 0x375   :  { %2590 = dma.done.wait [#allocation3], 256  }
 0x376   :  { %2591 = vsyncadd [#allocation3], 4294967040 }
 0x377   :  { %2437 = vsyncpa [#allocation3], 1 }

</bundles_post_ra>
